<compile_context>
chip_gen: v5e
topology: v5e:2x2
jax: 0.10.0
libtpu: 0.0.40
codegen_flags: <defaults>
</compile_context>

<pallas_src>
import functools

import jax
import jax.numpy as jnp
from jax import lax
from jax.experimental import pallas as pl
from jax.experimental.pallas import tpu as pltpu

HIDDEN = 16
INTERMEDIATE = 64
EPS = 1e-12
LANE = 128


def bert_output_kernel(x_ref, w_ref, s_ref, p_ref, res_ref, o_ref, *, eps):
    # x_ref:   (tm_p, pack*I)   packed intermediate activations tile (native dtype)
    # w_ref:   (pack*I, 128)    block-diagonal packed dense weight  (native dtype)
    # s_ref:   (128, 128)       block-diagonal segmented-mean matrix (f32)
    # p_ref:   (3, 128)         [bias; gamma; beta], tiled across lane groups (f32)
    # res_ref: (tm_p, 128)      packed residual tile
    # o_ref:   (tm_p, 128)      packed output tile (lane dense)

    # Main matmul at native dtype on the MXU, f32 accumulation.
    y = jnp.dot(x_ref[...], w_ref[...], preferred_element_type=jnp.float32)

    # Dropout with p=0.0 is the identity.
    # TODO(synk): PRNG mask via pltpu.prng_random_bits if hidden_dropout_prob > 0.
    y = y + p_ref[0:1, :] + res_ref[...].astype(jnp.float32)

    # Per-group (H-wide) LayerNorm statistics in one pass, broadcast back to every
    # lane of the group with a small f32 matmul (stats must stay f32 for accuracy).
    # TODO(synk): on v5e, if vmatmul binds, fuse mean/mean_sq into one matmul by
    #             stacking [y; y*y] along sublanes, or move to an XLU roll+add tree.
    s = s_ref[...]
    mean = jnp.dot(y, s, preferred_element_type=jnp.float32)
    mean_sq = jnp.dot(y * y, s, preferred_element_type=jnp.float32)
    var = jnp.maximum(mean_sq - mean * mean, 0.0)

    y = (y - mean) * lax.rsqrt(var + eps)          # rsqrt -> EUP slot
    y = y * p_ref[1:2, :] + p_ref[2:3, :]
    o_ref[...] = y.astype(o_ref.dtype)


def bert_output(hidden_states, input_tensor, w, b, gamma, beta,
                *, eps=EPS, tm=4096, mxu_dtype=None):
    # hidden_states: (B, S, I), input_tensor: (B, S, H); w stored as (I, H).
    B, S, I = hidden_states.shape
    H = input_tensor.shape[-1]
    assert LANE % H == 0, "lane-packing path requires H to divide 128"
    # TODO(synk): add an unpacked (tm, H) path for H >= 128 (real BERT widths).
    pack = LANE // H
    M = B * S

    if mxu_dtype is None:
        mxu_dtype = hidden_states.dtype            # bf16 models -> bf16 MXU path
    out_dtype = hidden_states.dtype

    # Sublane alignment from the narrowest tiled dtype (f32->8, bf16->16, int8->32).
    itemsizes = [jnp.dtype(d).itemsize for d in
                 (mxu_dtype, input_tensor.dtype, out_dtype)]
    align = 8 * (4 // min(itemsizes))

    # Pad only to a multiple of pack*align logical rows (tiny; zero for common BERT
    # shapes).  Ragged last grid tiles are handled by Pallas boundary masking.
    row_align = pack * align
    M_pad = ((M + row_align - 1) // row_align) * row_align

    x2d = hidden_states.reshape(M, I).astype(mxu_dtype)
    r2d = input_tensor.reshape(M, H)
    if M_pad != M:
        x2d = jnp.pad(x2d, ((0, M_pad - M), (0, 0)))
        r2d = jnp.pad(r2d, ((0, M_pad - M), (0, 0)))

    Mp = M_pad // pack
    # Fold `pack` logical rows into each physical row -> lane-dense (*, 128) slabs.
    x_pack = x2d.reshape(Mp, pack * I)
    r_pack = r2d.reshape(Mp, pack * H)

    # Tile selection: biggest aligned tile up to the cap; ensure >=2 grid steps when
    # the problem is large enough (v7x has 2 TensorCores sharded via "parallel").
    cap = min(1024, max(align, ((tm // pack) // align) * align))
    tm_p = min(cap, Mp)
    if tm_p == Mp and Mp >= 4 * align:
        tm_p = ((Mp // 2 + align - 1) // align) * align
    grid = (pl.cdiv(Mp, tm_p),)

    # Constants (built once per trace under jit).
    w_pack = jnp.kron(jnp.eye(pack, dtype=mxu_dtype),
                      w.astype(mxu_dtype))                               # (pack*I, 128)
    s_mean = jnp.kron(jnp.eye(pack, dtype=jnp.float32),
                      jnp.full((H, H), 1.0 / H, dtype=jnp.float32))      # (128, 128)
    params = jnp.stack([
        jnp.tile(b.astype(jnp.float32), pack),
        jnp.tile(gamma.astype(jnp.float32), pack),
        jnp.tile(beta.astype(jnp.float32), pack),
    ])                                                                   # (3, 128)

    bytes_x = jnp.dtype(mxu_dtype).itemsize
    bytes_r = jnp.dtype(input_tensor.dtype).itemsize
    bytes_o = jnp.dtype(out_dtype).itemsize
    cost = pl.CostEstimate(
        flops=Mp * (2 * pack * I * LANE + 4 * LANE * LANE),
        transcendentals=Mp * LANE,
        bytes_accessed=(x_pack.size * bytes_x + r_pack.size * bytes_r
                        + Mp * LANE * bytes_o + w_pack.size * bytes_x
                        + (s_mean.size + params.size) * 4),
    )

    out_pack = pl.pallas_call(
        functools.partial(bert_output_kernel, eps=eps),
        out_shape=jax.ShapeDtypeStruct((Mp, LANE), out_dtype),
        grid_spec=pltpu.PrefetchScalarGridSpec(
            num_scalar_prefetch=0,
            grid=grid,
            in_specs=[
                pl.BlockSpec((tm_p, pack * I), lambda i: (i, 0)),   # packed x tile
                pl.BlockSpec((pack * I, LANE), lambda i: (0, 0)),   # packed weight (const)
                pl.BlockSpec((LANE, LANE), lambda i: (0, 0)),       # segmented-mean (const)
                pl.BlockSpec((3, LANE), lambda i: (0, 0)),          # bias/gamma/beta (const)
                pl.BlockSpec((tm_p, LANE), lambda i: (i, 0)),       # packed residual tile
            ],
            out_specs=pl.BlockSpec((tm_p, LANE), lambda i: (i, 0)),
        ),
        compiler_params=pltpu.CompilerParams(
            dimension_semantics=("parallel",),
            vmem_limit_bytes=16 * 1024 * 1024,
        ),
        cost_estimate=cost,
    )(x_pack, w_pack, s_mean, params, r_pack)

    out = out_pack.reshape(M_pad, H)[:M]
    return out.reshape(B, S, H)


def reference(hidden_states, input_tensor, w, b, gamma, beta, eps=EPS):
    hs = hidden_states.astype(jnp.float32)
    it = input_tensor.astype(jnp.float32)
    y = jnp.einsum("bsi,ih->bsh", hs, w.astype(jnp.float32),
                   precision=lax.Precision.HIGHEST) + b.astype(jnp.float32)
    y = y + it
    mean = jnp.mean(y, axis=-1, keepdims=True)
    var = jnp.mean((y - mean) ** 2, axis=-1, keepdims=True)
    return (y - mean) / jnp.sqrt(var + eps) * gamma.astype(jnp.float32) \
        + beta.astype(jnp.float32)


if __name__ == "__main__":
    key = jax.random.PRNGKey(0)
    k1, k2, k3, k4, k5, k6 = jax.random.split(key, 6)

    # nn.Linear-like uniform init, weight stored as (in, out); LayerNorm default init.
    bound = 1.0 / (INTERMEDIATE ** 0.5)
    w = jax.random.uniform(k3, (INTERMEDIATE, HIDDEN), minval=-bound, maxval=bound,
                           dtype=jnp.float32)
    b = jax.random.uniform(k4, (HIDDEN,), minval=-bound, maxval=bound,
                           dtype=jnp.float32)
    gamma = jnp.ones((HIDDEN,), dtype=jnp.float32)
    beta = jnp.zeros((HIDDEN,), dtype=jnp.float32)

    fn = jax.jit(bert_output)

    # 1) Small f32 case (B=2, S=8).
    B, S = 2, 8
    hs = jax.random.normal(k1, (B, S, INTERMEDIATE), dtype=jnp.float32)
    it = jax.random.normal(k2, (B, S, HIDDEN), dtype=jnp.float32)
    out = jax.block_until_ready(fn(hs, it, w, b, gamma, beta))
    ref = reference(hs, it, w, b, gamma, beta)
    assert out.shape == (B, S, HIDDEN)
    assert jnp.allclose(out.astype(jnp.float32), ref, atol=1e-4, rtol=1e-4), \
        "f32 mismatch vs reference"

    # 2) Larger f32 case exercising multi-step grid + ragged last tile (no wrapper pad).
    B2, S2 = 4, 80
    hs2 = jax.random.normal(k5, (B2, S2, INTERMEDIATE), dtype=jnp.float32)
    it2 = jax.random.normal(k6, (B2, S2, HIDDEN), dtype=jnp.float32)
    out2 = jax.block_until_ready(fn(hs2, it2, w, b, gamma, beta))
    ref2 = reference(hs2, it2, w, b, gamma, beta)
    assert out2.shape == (B2, S2, HIDDEN)
    assert jnp.allclose(out2.astype(jnp.float32), ref2, atol=1e-4, rtol=1e-4), \
        "f32 (large) mismatch vs reference"

    # 3) bf16 activation path (bf16 MXU feed, bf16 store) with looser tolerance.
    hs_b = hs.astype(jnp.bfloat16)
    it_b = it.astype(jnp.bfloat16)
    out_b = jax.block_until_ready(fn(hs_b, it_b, w, b, gamma, beta))
    ref_b = reference(hs_b, it_b, w, b, gamma, beta)
    assert out_b.dtype == jnp.bfloat16
    assert jnp.allclose(out_b.astype(jnp.float32), ref_b, atol=5e-2, rtol=5e-2), \
        "bf16 mismatch vs reference"

    print("KERNEL_OK")
</pallas_src>

<mosaic_0001>
module attributes {stable_mosaic.version = 11 : i64} {
  func.func @bert_output_kernel(%arg0: i32, %arg1: memref<8x512xf32, #tpu.memory_space<vmem>>, %arg2: memref<512x128xf32, #tpu.memory_space<vmem>>, %arg3: memref<128x128xf32, #tpu.memory_space<vmem>>, %arg4: memref<3x128xf32, #tpu.memory_space<vmem>>, %arg5: memref<8x128xf32, #tpu.memory_space<vmem>>, %arg6: memref<8x128xf32, #tpu.memory_space<vmem>>) attributes {dimension_semantics = [#tpu.dimension_semantics<parallel>], iteration_bounds = array<i64: 1>, scalar_prefetch = 0 : i64, scratch_operands = 0 : i64, tpu.core_type = #tpu.core_type<tc>, window_params = [{transform_indices = @transform_0, window_bounds = array<i64: 8, 512>}, {pipeline_mode = #tpu.pipeline_mode<synchronous>, transform_indices = @transform_1, window_bounds = array<i64: 512, 128>}, {pipeline_mode = #tpu.pipeline_mode<synchronous>, transform_indices = @transform_2, window_bounds = array<i64: 128, 128>}, {pipeline_mode = #tpu.pipeline_mode<synchronous>, transform_indices = @transform_3, window_bounds = array<i64: 3, 128>}, {transform_indices = @transform_4, window_bounds = array<i64: 8, 128>}, {transform_indices = @transform_5, window_bounds = array<i64: 8, 128>}]} {
    %c0 = arith.constant 0 : index
    %c0_0 = arith.constant 0 : index
    %0 = vector.load %arg1[%c0, %c0_0] : memref<8x512xf32, #tpu.memory_space<vmem>>, vector<8x512xf32>
    %c0_1 = arith.constant 0 : index
    %c0_2 = arith.constant 0 : index
    %1 = vector.load %arg2[%c0_1, %c0_2] : memref<512x128xf32, #tpu.memory_space<vmem>>, vector<512x128xf32>
    %cst = arith.constant dense<0.000000e+00> : vector<8x128xf32>
    %2 = tpu.matmul %0, %1, %cst {dimension_numbers = #tpu.dot_dimension_numbers<[1], [0], [0], [1], [0, 0, 1, 1], [], []>} : vector<8x512xf32>, vector<512x128xf32>, vector<8x128xf32> -> vector<8x128xf32>
    %c0_3 = arith.constant 0 : index
    %c0_4 = arith.constant 0 : index
    %3 = vector.load %arg4[%c0_3, %c0_4] : memref<3x128xf32, #tpu.memory_space<vmem>>, vector<1x128xf32>
    %4 = vector.broadcast %3 : vector<1x128xf32> to vector<8x128xf32>
    %5 = arith.addf %2, %4 : vector<8x128xf32>
    %c0_5 = arith.constant 0 : index
    %c0_6 = arith.constant 0 : index
    %6 = vector.load %arg5[%c0_5, %c0_6] : memref<8x128xf32, #tpu.memory_space<vmem>>, vector<8x128xf32>
    %7 = arith.addf %5, %6 : vector<8x128xf32>
    %c0_7 = arith.constant 0 : index
    %c0_8 = arith.constant 0 : index
    %8 = vector.load %arg3[%c0_7, %c0_8] : memref<128x128xf32, #tpu.memory_space<vmem>>, vector<128x128xf32>
    %cst_9 = arith.constant dense<0.000000e+00> : vector<8x128xf32>
    %9 = tpu.matmul %7, %8, %cst_9 {dimension_numbers = #tpu.dot_dimension_numbers<[1], [0], [0], [1], [0, 0, 1, 1], [], []>} : vector<8x128xf32>, vector<128x128xf32>, vector<8x128xf32> -> vector<8x128xf32>
    %10 = arith.mulf %7, %7 : vector<8x128xf32>
    %cst_10 = arith.constant dense<0.000000e+00> : vector<8x128xf32>
    %11 = tpu.matmul %10, %8, %cst_10 {dimension_numbers = #tpu.dot_dimension_numbers<[1], [0], [0], [1], [0, 0, 1, 1], [], []>} : vector<8x128xf32>, vector<128x128xf32>, vector<8x128xf32> -> vector<8x128xf32>
    %12 = arith.mulf %9, %9 : vector<8x128xf32>
    %13 = arith.subf %11, %12 : vector<8x128xf32>
    %cst_11 = arith.constant 0.000000e+00 : f32
    %14 = vector.broadcast %cst_11 : f32 to vector<8x128xf32>
    %15 = arith.maximumf %13, %14 : vector<8x128xf32>
    %16 = arith.subf %7, %9 : vector<8x128xf32>
    %cst_12 = arith.constant 9.99999996E-13 : f32
    %17 = vector.broadcast %cst_12 : f32 to vector<8x128xf32>
    %18 = arith.addf %15, %17 : vector<8x128xf32>
    %19 = math.rsqrt %18 : vector<8x128xf32>
    %20 = arith.mulf %16, %19 : vector<8x128xf32>
    %c1 = arith.constant 1 : index
    %c0_13 = arith.constant 0 : index
    %21 = vector.load %arg4[%c1, %c0_13] : memref<3x128xf32, #tpu.memory_space<vmem>>, vector<1x128xf32>
    %22 = vector.broadcast %21 : vector<1x128xf32> to vector<8x128xf32>
    %23 = arith.mulf %20, %22 : vector<8x128xf32>
    %c2 = arith.constant 2 : index
    %c0_14 = arith.constant 0 : index
    %24 = vector.load %arg4[%c2, %c0_14] : memref<3x128xf32, #tpu.memory_space<vmem>>, vector<1x128xf32>
    %25 = vector.broadcast %24 : vector<1x128xf32> to vector<8x128xf32>
    %26 = arith.addf %23, %25 : vector<8x128xf32>
    %c0_15 = arith.constant 0 : index
    %c0_16 = arith.constant 0 : index
    %27 = vector.load %arg6[%c0_15, %c0_16] : memref<8x128xf32, #tpu.memory_space<vmem>>, vector<8x128xf32>
    tpu.vector_store %arg6[%c0_15, %c0_16], %26 {strides = array<i32>} : memref<8x128xf32, #tpu.memory_space<vmem>>, vector<8x128xf32>,
    return
  }
  func.func @transform_0(%arg0: i32) -> (i32, i32) {
    %c0_i32 = arith.constant 0 : i32
    %c0_i32_0 = arith.constant 0 : i32
    return %arg0, %c0_i32 : i32, i32
  }
  func.func @transform_1(%arg0: i32) -> (i32, i32) {
    %c0_i32 = arith.constant 0 : i32
    %c0_i32_0 = arith.constant 0 : i32
    %c0_i32_1 = arith.constant 0 : i32
    return %c0_i32, %c0_i32_0 : i32, i32
  }
  func.func @transform_2(%arg0: i32) -> (i32, i32) {
    %c0_i32 = arith.constant 0 : i32
    %c0_i32_0 = arith.constant 0 : i32
    %c0_i32_1 = arith.constant 0 : i32
    return %c0_i32, %c0_i32_0 : i32, i32
  }
  func.func @transform_3(%arg0: i32) -> (i32, i32) {
    %c0_i32 = arith.constant 0 : i32
    %c0_i32_0 = arith.constant 0 : i32
    %c0_i32_1 = arith.constant 0 : i32
    return %c0_i32, %c0_i32_0 : i32, i32
  }
  func.func @transform_4(%arg0: i32) -> (i32, i32) {
    %c0_i32 = arith.constant 0 : i32
    %c0_i32_0 = arith.constant 0 : i32
    return %arg0, %c0_i32 : i32, i32
  }
  func.func @transform_5(%arg0: i32) -> (i32, i32) {
    %c0_i32 = arith.constant 0 : i32
    %c0_i32_0 = arith.constant 0 : i32
    return %arg0, %c0_i32 : i32, i32
  }
}

</mosaic_0001>

<bundles_post_ra>
// kernel: tile.18
= control target key start
LH: loop header
LB: loop body
LE: loop exit
PB: predicated region body
PF: predicated region fallthrough
CT: control target
= control target key end

     0   :  { %s22_s0 = inlined_call_operand.vmem [shape: f32[16], index: 0, kind: input, shape index: {}]   ;;  %s23_s1 = inlined_call_operand.vmem [shape: f32[8,16], index: 1, kind: output, shape index: {}]  }
   0x1   :  { %v4_v0 = vld [vmem:[%s22_s0] ss:$0 sm:$0xff] }
   0x2   :  { %5 = vst [vmem:[%s23_s1] sm:$0xff] %v4_v0 }

// kernel: tile.27
= control target key start
LH: loop header
LB: loop body
LE: loop exit
PB: predicated region body
PF: predicated region fallthrough
CT: control target
= control target key end

     0   :  { %s67_s10 = smov 112   ;;  %s68_s11 = smov 80   ;;  %vm3_vm0 = vcmask 130048   ;;  %vm9_vm1 = vcmask 1048448   ;;  %vm15_vm2 = vcmask 917248   ;;  %vm21_vm3 = vcmask 786048   ;;  %s111_s0 = inlined_call_operand.vmem [shape: f32[8,16], index: 0, kind: input, shape index: {}]   ;;  %s112_s1 = inlined_call_operand.vmem [shape: f32[1,128], index: 1, kind: output, shape index: {}]  }
   0x1   :  { %v53_v0 = vld [vmem:[%s111_s0 + $0x7] sm:$0x1]   ;;  %v55_v1 = vld [vmem:[%s111_s0 + $0x5] sm:$0x1]   ;;  %v57_v2 = vld [vmem:[%s111_s0 + $0x3] sm:$0x1]  }
   0x2   :  { %7 = vrot.lane.b32.xlu0 %v53_v0, %s67_s10  ;;  %19 = vrot.lane.b32.xlu1 %v55_v1, %s68_s11  ;;  %s69_s14 = smov 48   ;;  %v54_v3 = vld [vmem:[%s111_s0 + $0x6] sm:$0x1]   ;;  %v56_v4 = vld [vmem:[%s111_s0 + $0x4] sm:$0x1]   ;;  %s70_s21 = smov 96  }
   0x3   :  { %31 = vrot.lane.b32.xlu2 %v57_v2, %s69_s14  ;;  %v58_v5 = vld [vmem:[%s111_s0 + $0x2] sm:$0x1]   ;;  %s71_s22 = smov 64   ;;  %s72_s23 = smov 32   ;;  %v59_v6 = vld [vmem:[%s111_s0 + $0x1] sm:$0x1]  }
   0x4   :  { %s73_s26 = smov 16   ;;  %v2_v7 = vld [vmem:[%s111_s0] sm:$0x1]   ;;  %vm27_vm4 = vcmask 654848   ;;  %vm33_vm5 = vcmask 523648   ;;  %vm39_vm6 = vcmask 392448  }
   0x5   :  { %4 = vst.msk [vmem:[#allocation0] sm:$0x1] %vm3_vm0, %v2_v7   ;;  %vm45_vm7 = vcmask 261248  }
   0xa   :  { %13 = vrot.lane.b32.xlu0 %v54_v3, %s70_s21  ;;  %25 = vrot.lane.b32.xlu1 %v56_v4, %s71_s22 }
   0xb   :  { %37 = vrot.lane.b32.xlu2 %v58_v5, %s72_s23 }
  0x12   :  { %43 = vrot.lane.b32.xlu0 %v59_v6, %s73_s26 }
  0x5d   :  { %v32_v8 = vpop.permute.xlu2 %31  }
  0x65   :  { %v38_v9 = vpop.permute.xlu2 %37  }
  0x74   :  { %v8_v10 = vpop.permute.xlu0 %7   ;;  %v20_v11 = vpop.permute.xlu1 %19  }
  0x75   :  { %10 = vst.msk [vmem:[#allocation0] sm:$0x1] %vm9_vm1, %v8_v10  }
  0x7c   :  { %v14_v12 = vpop.permute.xlu0 %13   ;;  %v26_v13 = vpop.permute.xlu1 %25  }
  0x7d   :  { %16 = vst.msk [vmem:[#allocation0] sm:$0x1] %vm15_vm2, %v14_v12  }
  0x7e   :  { %22 = vst.msk [vmem:[#allocation0] sm:$0x1] %vm21_vm3, %v20_v11  }
  0x7f   :  { %28 = vst.msk [vmem:[#allocation0] sm:$0x1] %vm27_vm4, %v26_v13  }
  0x80   :  { %34 = vst.msk [vmem:[#allocation0] sm:$0x1] %vm33_vm5, %v32_v8  }
  0x81   :  { %40 = vst.msk [vmem:[#allocation0] sm:$0x1] %vm39_vm6, %v38_v9  }
  0x84   :  { %v44_v14 = vpop.permute.xlu0 %43  }
  0x85   :  { %46 = vst.msk [vmem:[#allocation0] sm:$0x1] %vm45_vm7, %v44_v14  }
  0x8c   :  { %v49_v15 = vld [vmem:[#allocation0] sm:$0x1] }
  0x8d   :  { %52 = vst [vmem:[%s112_s1] sm:$0x1] %v49_v15 }

// kernel: bert_output.1
= control target key start
LH: loop header
LB: loop body
LE: loop exit
PB: predicated region body
PF: predicated region fallthrough
CT: control target
= control target key end

     0   :  { %s558_s1 = inlined_call_operand.vmem [shape: f32[512,128], index: 1, kind: input, shape index: {}]   ;;  %s559_s3 = inlined_call_operand.vmem [shape: f32[3,128], index: 3, kind: input, shape index: {}]   ;;  %s560_s0 = inlined_call_operand.vmem [shape: f32[8,512], index: 0, kind: input, shape index: {}]   ;;  %s561_s2 = inlined_call_operand.vmem [shape: f32[128,128], index: 2, kind: input, shape index: {}]   ;;  %s562_s4 = inlined_call_operand.vmem [shape: f32[8,128], index: 4, kind: input, shape index: {}]   ;;  %s563_s5 = inlined_call_operand.vmem [shape: f32[8,128], index: 5, kind: output, shape index: {}]  }
   0x1   :  { %v71_v0 = vld [vmem:[%s558_s1 + $0x178] sm:$0xff]  ;;  %v70_v2 = vld [vmem:[%s558_s1 + $0x170] sm:$0xff]  ;;  %v69_v6 = vld [vmem:[%s558_s1 + $0x168] sm:$0xff] }
   0x2   :  { %v39_v1 = vld [vmem:[%s558_s1 + $0x78] sm:$0xff]  ;;  %130 = vmatpush.msra.mxu2 %v71_v0  ;;  %v38_v4 = vld [vmem:[%s558_s1 + $0x70] sm:$0xff]  ;;  %v37_v8 = vld [vmem:[%s558_s1 + $0x68] sm:$0xff] }
   0x3   :  { %90 = vmatpush.msra.mxu0 %v39_v1  ;;  %v87_v3 = vld [vmem:[%s558_s1 + $0x1f8] sm:$0xff]  ;;  %v86_v7 = vld [vmem:[%s558_s1 + $0x1f0] sm:$0xff]  ;;  %v85_v10 = vld [vmem:[%s558_s1 + $0x1e8] sm:$0xff] }
   0x4   :  { %v55_v5 = vld [vmem:[%s558_s1 + $0xf8] sm:$0xff]  ;;  %150 = vmatpush.msra.mxu3 %v87_v3  ;;  %131 = vmatpush.msra.mxu2 %v70_v2  ;;  %v54_v9 = vld [vmem:[%s558_s1 + $0xf0] sm:$0xff]  ;;  %v68_v11 = vld [vmem:[%s558_s1 + $0x160] sm:$0xff] }
   0x5   :  { %110 = vmatpush.msra.mxu1 %v55_v5  ;;  %91 = vmatpush.msra.mxu0 %v38_v4  ;;  %v36_v12 = vld [vmem:[%s558_s1 + $0x60] sm:$0xff]  ;;  %v53_v13 = vld [vmem:[%s558_s1 + $0xe8] sm:$0xff]  ;;  %v67_v16 = vld [vmem:[%s558_s1 + $0x158] sm:$0xff] }
   0x6   :  { %151 = vmatpush.msra.mxu3 %v86_v7  ;;  %132 = vmatpush.msra.mxu2 %v69_v6  ;;  %v84_v14 = vld [vmem:[%s558_s1 + $0x1e0] sm:$0xff]  ;;  %v35_v17 = vld [vmem:[%s558_s1 + $0x58] sm:$0xff]  ;;  %v66_v20 = vld [vmem:[%s558_s1 + $0x150] sm:$0xff] }
   0x7   :  { %111 = vmatpush.msra.mxu1 %v54_v9  ;;  %92 = vmatpush.msra.mxu0 %v37_v8  ;;  %v52_v15 = vld [vmem:[%s558_s1 + $0xe0] sm:$0xff]  ;;  %v83_v18 = vld [vmem:[%s558_s1 + $0x1d8] sm:$0xff]  ;;  %v34_v21 = vld [vmem:[%s558_s1 + $0x50] sm:$0xff] }
   0x8   :  { %152 = vmatpush.msra.mxu3 %v85_v10  ;;  %133 = vmatpush.msra.mxu2 %v68_v11  ;;  %v51_v19 = vld [vmem:[%s558_s1 + $0xd8] sm:$0xff]  ;;  %v82_v22 = vld [vmem:[%s558_s1 + $0x1d0] sm:$0xff]  ;;  %v65_v24 = vld [vmem:[%s558_s1 + $0x148] sm:$0xff] }
   0x9   :  { %112 = vmatpush.msra.mxu1 %v53_v13  ;;  %93 = vmatpush.msra.mxu0 %v36_v12  ;;  %v50_v23 = vld [vmem:[%s558_s1 + $0xd0] sm:$0xff]  ;;  %v33_v25 = vld [vmem:[%s558_s1 + $0x48] sm:$0xff]  ;;  %v64_v28 = vld [vmem:[%s558_s1 + $0x140] sm:$0xff] }
   0xa   :  { %153 = vmatpush.msra.mxu3 %v84_v14  ;;  %134 = vmatpush.msra.mxu2 %v67_v16  ;;  %v81_v26 = vld [vmem:[%s558_s1 + $0x1c8] sm:$0xff]  ;;  %v32_v29 = vld [vmem:[%s558_s1 + $0x40] sm:$0xff]  ;;  %v63_v32 = vld [vmem:[%s558_s1 + $0x138] sm:$0xff] }
   0xb   :  { %113 = vmatpush.msra.mxu1 %v52_v15  ;;  %94 = vmatpush.msra.mxu0 %v35_v17  ;;  %v49_v27 = vld [vmem:[%s558_s1 + $0xc8] sm:$0xff]  ;;  %v80_v30 = vld [vmem:[%s558_s1 + $0x1c0] sm:$0xff]  ;;  %v31_v33 = vld [vmem:[%s558_s1 + $0x38] sm:$0xff] }
   0xc   :  { %154 = vmatpush.msra.mxu3 %v83_v18  ;;  %135 = vmatpush.msra.mxu2 %v66_v20  ;;  %v48_v31 = vld [vmem:[%s558_s1 + $0xc0] sm:$0xff]  ;;  %v79_v34 = vld [vmem:[%s558_s1 + $0x1b8] sm:$0xff]  ;;  %v62_v36 = vld [vmem:[%s558_s1 + $0x130] sm:$0xff] }
   0xd   :  { %114 = vmatpush.msra.mxu1 %v51_v19  ;;  %95 = vmatpush.msra.mxu0 %v34_v21  ;;  %v47_v35 = vld [vmem:[%s558_s1 + $0xb8] sm:$0xff]  ;;  %v30_v37 = vld [vmem:[%s558_s1 + $0x30] sm:$0xff]  ;;  %v61_v40 = vld [vmem:[%s558_s1 + $0x128] sm:$0xff] }
   0xe   :  { %155 = vmatpush.msra.mxu3 %v82_v22  ;;  %136 = vmatpush.msra.mxu2 %v65_v24  ;;  %v78_v38 = vld [vmem:[%s558_s1 + $0x1b0] sm:$0xff]  ;;  %v29_v41 = vld [vmem:[%s558_s1 + $0x28] sm:$0xff]  ;;  %v60_v44 = vld [vmem:[%s558_s1 + $0x120] sm:$0xff] }
   0xf   :  { %115 = vmatpush.msra.mxu1 %v50_v23  ;;  %96 = vmatpush.msra.mxu0 %v33_v25  ;;  %v46_v39 = vld [vmem:[%s558_s1 + $0xb0] sm:$0xff]  ;;  %v77_v42 = vld [vmem:[%s558_s1 + $0x1a8] sm:$0xff]  ;;  %v28_v45 = vld [vmem:[%s558_s1 + $0x20] sm:$0xff] }
  0x10   :  { %156 = vmatpush.msra.mxu3 %v81_v26  ;;  %137 = vmatpush.msra.mxu2 %v64_v28  ;;  %v45_v43 = vld [vmem:[%s558_s1 + $0xa8] sm:$0xff]  ;;  %v76_v46 = vld [vmem:[%s558_s1 + $0x1a0] sm:$0xff]  ;;  %v59_v48 = vld [vmem:[%s558_s1 + $0x118] sm:$0xff] }
  0x11   :  { %116 = vmatpush.msra.mxu1 %v49_v27  ;;  %97 = vmatpush.msra.mxu0 %v32_v29  ;;  %v44_v47 = vld [vmem:[%s558_s1 + $0xa0] sm:$0xff]  ;;  %v27_v49 = vld [vmem:[%s558_s1 + $0x18] sm:$0xff]  ;;  %v58_v52 = vld [vmem:[%s558_s1 + $0x110] sm:$0xff] }
  0x12   :  { %157 = vmatpush.msra.mxu3 %v80_v30  ;;  %138 = vmatpush.msra.mxu2 %v63_v32  ;;  %v75_v50 = vld [vmem:[%s558_s1 + $0x198] sm:$0xff]  ;;  %v26_v53 = vld [vmem:[%s558_s1 + $0x10] sm:$0xff]  ;;  %v57_v54 = vld [vmem:[%s558_s1 + $0x108] sm:$0xff] }
  0x13   :  { %117 = vmatpush.msra.mxu1 %v48_v31  ;;  %98 = vmatpush.msra.mxu0 %v31_v33  ;;  %v43_v51 = vld [vmem:[%s558_s1 + $0x98] sm:$0xff]  ;;  %v74_v55 = vld [vmem:[%s558_s1 + $0x190] sm:$0xff]  ;;  %v25_v57 = vld [vmem:[%s558_s1 + $0x8] sm:$0xff] }
  0x14   :  { %158 = vmatpush.msra.mxu3 %v79_v34  ;;  %139 = vmatpush.msra.mxu2 %v62_v36  ;;  %v42_v56 = vld [vmem:[%s558_s1 + $0x90] sm:$0xff]  ;;  %v73_v58 = vld [vmem:[%s558_s1 + $0x188] sm:$0xff]  ;;  %v56_v60 = vld [vmem:[%s558_s1 + $0x100] sm:$0xff] }
  0x15   :  { %118 = vmatpush.msra.mxu1 %v47_v35  ;;  %99 = vmatpush.msra.mxu0 %v30_v37  ;;  %v41_v59 = vld [vmem:[%s558_s1 + $0x88] sm:$0xff]  ;;  %v24_v61 = vld [vmem:[%s558_s1] sm:$0xff]  ;;  %v22_v62 = vld [vmem:[%s560_s0 + $0x10] sm:$0xff] }
  0x16   :  { %159 = vmatpush.msra.mxu3 %v78_v38  ;;  %140 = vmatpush.msra.mxu2 %v61_v40  ;;  %v72_v63 = vld [vmem:[%s558_s1 + $0x180] sm:$0xff]  ;;  %v23_v1 = vld [vmem:[%s560_s0 + $0x18] sm:$0xff]  ;;  %v21_v4 = vld [vmem:[%s560_s0 + $0x8] sm:$0xff] }
  0x17   :  { %119 = vmatpush.msra.mxu1 %v46_v39  ;;  %100 = vmatpush.msra.mxu0 %v29_v41  ;;  %v20_v0 = vld [vmem:[%s560_s0] sm:$0xff]  ;;  %v187_v3 = vld [vmem:[%s561_s2 + $0x78] sm:$0xff]  ;;  %v186_v5 = vld [vmem:[%s561_s2 + $0x70] sm:$0xff] }
  0x18   :  { %160 = vmatpush.msra.mxu3 %v77_v42  ;;  %141 = vmatpush.msra.mxu2 %v60_v44  ;;  %v40_v2 = vld [vmem:[%s558_s1 + $0x80] sm:$0xff]  ;;  %v185_v6 = vld [vmem:[%s561_s2 + $0x68] sm:$0xff]  ;;  %v183_v8 = vld [vmem:[%s561_s2 + $0x58] sm:$0xff] }
  0x19   :  { %120 = vmatpush.msra.mxu1 %v45_v43  ;;  %101 = vmatpush.msra.mxu0 %v28_v45  ;;  %v184_v7 = vld [vmem:[%s561_s2 + $0x60] sm:$0xff]  ;;  %v182_v9 = vld [vmem:[%s561_s2 + $0x50] sm:$0xff]  ;;  %v181_v10 = vld [vmem:[%s561_s2 + $0x48] sm:$0xff] }
  0x1a   :  { %161 = vmatpush.msra.mxu3 %v76_v46  ;;  %142 = vmatpush.msra.mxu2 %v59_v48  ;;  %v180_v11 = vld [vmem:[%s561_s2 + $0x40] sm:$0xff]  ;;  %v179_v12 = vld [vmem:[%s561_s2 + $0x38] sm:$0xff]  ;;  %v178_v13 = vld [vmem:[%s561_s2 + $0x30] sm:$0xff] }
  0x1b   :  { %121 = vmatpush.msra.mxu1 %v44_v47  ;;  %102 = vmatpush.msra.mxu0 %v27_v49  ;;  %v177_v14 = vld [vmem:[%s561_s2 + $0x28] sm:$0xff]  ;;  %v176_v15 = vld [vmem:[%s561_s2 + $0x20] sm:$0xff]  ;;  %v175_v16 = vld [vmem:[%s561_s2 + $0x18] sm:$0xff] }
  0x1c   :  { %162 = vmatpush.msra.mxu3 %v75_v50  ;;  %143 = vmatpush.msra.mxu2 %v58_v52  ;;  %v174_v17 = vld [vmem:[%s561_s2 + $0x10] sm:$0xff]  ;;  %v173_v18 = vld [vmem:[%s561_s2 + $0x8] sm:$0xff]  ;;  %v172_v19 = vld [vmem:[%s561_s2] sm:$0xff] }
  0x1d   :  { %122 = vmatpush.msra.mxu1 %v43_v51  ;;  %103 = vmatpush.msra.mxu0 %v26_v53  ;;  %v256_v20 = vld [vmem:[%s559_s3] ss:$0 sm:$0xff]  ;;  %v257_v44 = vld [vmem:[%s559_s3 + $0x1] ss:$0 sm:$0xff]  ;;  %v258_v47 = vld [vmem:[%s559_s3 + $0x2] ss:$0 sm:$0xff] }
  0x1e   :  { %163 = vmatpush.msra.mxu3 %v74_v55  ;;  %144 = vmatpush.msra.mxu2 %v57_v54  ;;  %v170_v28 = vld [vmem:[%s562_s4] sm:$0xff] }
  0x1f   :  { %123 = vmatpush.msra.mxu1 %v42_v56  ;;  %104 = vmatpush.msra.mxu0 %v25_v57 }
  0x20   :  { %164 = vmatpush.msra.mxu3 %v73_v58  ;;  %145 = vmatpush.msra.mxu2 %v56_v60 }
  0x21   :  { %124 = vmatpush.msra.mxu1 %v41_v59  ;;  %105 = vmatpush.msra.mxu0 %v24_v61 }
  0x22   :  { %146 = vmatmul.f32.vlgmr.msra.gmra.mxu2 %v22_v62  ;;  %165 = vmatpush.msra.mxu3 %v72_v63 }
  0x23   :  { %106 = vmatmul.f32.vlgmr.msra.gmra.mxu0 %v20_v0  ;;  %166 = vmatmul.f32.vlgmr.msra.gmra.mxu3 %v23_v1 }
  0x24   :  { %125 = vmatpush.msra.mxu1 %v40_v2  ;;  %188 = vmatpush.msrb.mxu0 %v187_v3 }
  0x25   :  { %126 = vmatmul.f32.vlgmr.msra.gmra.mxu1 %v21_v4 }
  0x26   :  { %189 = vmatpush.msrb.mxu0 %v186_v5  ;;  %209 = vmatpush.msrb.mxu1 %v187_v3 }
  0x28   :  { %190 = vmatpush.msrb.mxu0 %v185_v6  ;;  %210 = vmatpush.msrb.mxu1 %v186_v5 }
  0x2a   :  { %191 = vmatpush.msrb.mxu0 %v184_v7  ;;  %211 = vmatpush.msrb.mxu1 %v185_v6 }
  0x2c   :  { %192 = vmatpush.msrb.mxu0 %v183_v8  ;;  %212 = vmatpush.msrb.mxu1 %v184_v7 }
  0x2e   :  { %193 = vmatpush.msrb.mxu0 %v182_v9  ;;  %213 = vmatpush.msrb.mxu1 %v183_v8 }
  0x30   :  { %194 = vmatpush.msrb.mxu0 %v181_v10  ;;  %214 = vmatpush.msrb.mxu1 %v182_v9 }
  0x32   :  { %195 = vmatpush.msrb.mxu0 %v180_v11  ;;  %215 = vmatpush.msrb.mxu1 %v181_v10 }
  0x34   :  { %196 = vmatpush.msrb.mxu0 %v179_v12  ;;  %216 = vmatpush.msrb.mxu1 %v180_v11 }
  0x36   :  { %197 = vmatpush.msrb.mxu0 %v178_v13  ;;  %217 = vmatpush.msrb.mxu1 %v179_v12 }
  0x38   :  { %218 = vmatpush.msrb.mxu1 %v178_v13  ;;  %198 = vmatpush.msrb.mxu0 %v177_v14 }
  0x3a   :  { %219 = vmatpush.msrb.mxu1 %v177_v14  ;;  %199 = vmatpush.msrb.mxu0 %v176_v15 }
  0x3c   :  { %220 = vmatpush.msrb.mxu1 %v176_v15  ;;  %200 = vmatpush.msrb.mxu0 %v175_v16 }
  0x3e   :  { %221 = vmatpush.msrb.mxu1 %v175_v16  ;;  %201 = vmatpush.msrb.mxu0 %v174_v17 }
  0x40   :  { %222 = vmatpush.msrb.mxu1 %v174_v17  ;;  %202 = vmatpush.msrb.mxu0 %v173_v18 }
  0x42   :  { %223 = vmatpush.msrb.mxu1 %v173_v18  ;;  %203 = vmatpush.msrb.mxu0 %v172_v19 }
  0x44   :  { %224 = vmatpush.msrb.mxu1 %v172_v19 }
  0xa0   :  { %v107_v21 = vpop.f32.mrf.mxu0 }
  0xa1   :  { %v108_v22 = vadd.f32 %v256_v20, %v107_v21 }
  0xa2   :  { %v127_v23 = vpop.f32.mrf.mxu1 }
  0xa3   :  { %v128_v24 = vadd.f32 %v127_v23, %v108_v22 }
  0xa5   :  { %v147_v25 = vpop.f32.mrf.mxu2 }
  0xa6   :  { %v148_v26 = vadd.f32 %v147_v25, %v128_v24  ;;  %v167_v27 = vpop.f32.mrf.mxu3 }
  0xa8   :  { %v168_v29 = vadd.f32 %v167_v27, %v148_v26 }
  0xaa   :  { %v171_v30 = vadd.f32 %v170_v28, %v168_v29 }
  0xac   :  { %204 = vmatmul.f32.vlgmr.msrb.gmra.mxu0 %v171_v30  ;;  %v208_v31 = vmul.f32 %v171_v30, %v171_v30 }
  0xae   :  { %225 = vmatmul.f32.vlgmr.msrb.gmra.mxu1 %v208_v31 }
 0x129   :  { %v205_v32 = vpop.f32.mrf.mxu0 }
 0x12a   :  { %v229_v33 = vmul.f32 %v205_v32, %v205_v32  ;;  %v232_v45 = vsub.f32 %v171_v30, %v205_v32 }
 0x12b   :  { %v226_v34 = vpop.f32.mrf.mxu1 }
 0x12c   :  { %v230_v35 = vsub.f32 %v226_v34, %v229_v33 }
 0x12e   :  { %v231_v36 = vmax.f32 %v230_v35, 0.0 }
 0x130   :  { %v233_v37 = vadd.f32 1e-12, %v231_v36 }
 0x132   :  { %259 = vrsqrt.f32 %v233_v37  ;;  %vm240_vm1 = vweird.f32 %v233_v37 }
 0x138   :  { %v260_v38 = vpop.eup %259 }
 0x139   :  { %v235_v39 = vmul.f32 %v260_v38, %v233_v37  ;;  %vm241_vm0 = vweird.f32 %v260_v38 }
 0x13a   :  { %vm242_vm2 = vmor %vm240_vm1, %vm241_vm0 }
 0x13b   :  { %v236_v40 = vmul.f32 %v260_v38, %v235_v39 }
 0x13d   :  { %v237_v41 = vmul.f32 0.5, %v236_v40 }
 0x13f   :  { %v238_v42 = vsub.f32 1.5, %v237_v41 }
 0x141   :  { %v239_v43 = vmul.f32 %v260_v38, %v238_v42 }
 0x143   :  { %v243_v46 = vsel %vm242_vm2, %v260_v38, %v239_v43 }
 0x144   :  { %v244_v48 = vmul.f32 %v243_v46, %v232_v45 }
 0x146   :  { %v247_v49 = vmul.f32 %v257_v44, %v244_v48 }
 0x148   :  { %v250_v50 = vadd.f32 %v258_v47, %v247_v49 }
 0x14a   :  { %251 = vst [vmem:[%s563_s5] sm:$0xff] %v250_v50 }

</bundles_post_ra>
